<compile_context>
chip_gen: v7x
topology: tpu7x:2x2x1
jax: 0.10.0
libtpu: 0.0.40
codegen_flags: <defaults>
</compile_context>

<pallas_src>
import functools

import jax
import jax.numpy as jnp
import numpy as np
from jax.experimental import pallas as pl
from jax.experimental.pallas import tpu as pltpu

_THRESHOLD_SQ = 25.0  # reference forward() hard-codes `cluster_pred < 5`


def _leaf_metrics_kernel(xi_ref, xj_ref, ti_ref, tj_ref,
                         tp_ref, s_ref, c_ref,
                         *, n_valid, needs_mask):
    """One grid step = one (Ti, Tj) tile of the pairwise matrix for one batch."""
    j = pl.program_id(2)

    @pl.when(j == 0)
    def _init():
        tp_ref[...] = jnp.zeros_like(tp_ref)
        s_ref[...] = jnp.zeros_like(s_ref)
        c_ref[...] = jnp.zeros_like(c_ref)

    xi = xi_ref[0]          # (Ti, D)  point-major block of rows
    xj = xj_ref[0]          # (D, Tj)  coord-major block of columns
    ti = ti_ref[0]          # (Ti, 1)  labels for rows
    tj = tj_ref[0]          # (1, Tj)  labels for columns
    Ti, D = xi.shape
    Tj = xj.shape[1]

    # Squared pairwise distance accumulated per coordinate (D is tiny & static,
    # loop is unrolled); every intermediate stays a lane-dense (Ti, Tj) f32 tile.
    sq = jnp.zeros((Ti, Tj), dtype=jnp.float32)
    for d in range(D):
        diff = xi[:, d:d + 1] - xj[d:d + 1, :]   # (Ti,1) - (1,Tj) -> (Ti,Tj)
        sq = sq + diff * diff

    same = ti == tj                  # cluster_gt == 0  (direct label equality)
    close = sq < _THRESHOLD_SQ       # cluster_pred < 5 (sqrt is monotone)

    if needs_mask:                   # static: only when N was padded to 128-mult
        i = pl.program_id(1)
        rows = jax.lax.broadcasted_iota(jnp.int32, (Ti, Tj), 0) + i * Ti
        cols = jax.lax.broadcasted_iota(jnp.int32, (Ti, Tj), 1) + j * Tj
        valid = (rows < n_valid) & (cols < n_valid)
        same = same & valid
        close_v = close & valid
    else:
        close_v = close

    # Only 3 reductions; `same` already carries the validity mask so
    # same & close == same & close & valid.
    tp = jnp.sum((same & close).astype(jnp.float32))   # TP
    s = jnp.sum(same.astype(jnp.float32))              # TP + FN
    c = jnp.sum(close_v.astype(jnp.float32))           # TP + FP

    # Accumulate (broadcast scalar over the lane-dense output block; wrapper
    # reads element [...,0,0]).  Output block stays resident across the j axis.
    tp_ref[...] += tp
    s_ref[...] += s
    c_ref[...] += c


def leaf_metrics(x, target, dist=5.0):
    """x: (B, N, D) float; target: (B, N) int cluster ids. Returns (Acc, P, R, F)."""
    # `dist` kept for interface parity with the PyTorch module; forward() there
    # ignores self.threshold and uses the literal 5, which the kernel reproduces.
    del dist
    x = x.astype(jnp.float32)
    B, N, D = x.shape

    # Pad points to a multiple of 128 so compares/reductions run on full vregs.
    n_pad = ((N + 127) // 128) * 128
    pad = n_pad - N
    x_p = jnp.pad(x, ((0, 0), (0, pad), (0, 0)))
    t_p = jnp.pad(target.astype(jnp.float32), ((0, 0), (0, pad)),
                  constant_values=-1.0)

    # Both layouts prepared in the wrapper: no lane<->sublane relayout in-kernel.
    xi = x_p                                   # (B, n_pad, D) point-major
    xj = jnp.transpose(x_p, (0, 2, 1))         # (B, D, n_pad) coord-major
    ti = t_p[:, :, None]                       # (B, n_pad, 1)
    tj = t_p[:, None, :]                       # (B, 1, n_pad)

    # Square-ish tiles; n_pad is a multiple of 128 so 128 always divides it.
    def _tile(pref):
        return pref if n_pad % pref == 0 else 128
    Ti = _tile(256)
    Tj = _tile(256)
    Gi = n_pad // Ti
    Gj = n_pad // Tj

    kernel = functools.partial(_leaf_metrics_kernel,
                               n_valid=N, needs_mask=(pad > 0))

    count_shape = jax.ShapeDtypeStruct((B, Gi, 8, 128), jnp.float32)
    count_spec = pl.BlockSpec((1, 1, 8, 128), lambda b, i, j: (b, i, 0, 0))

    tp_o, s_o, c_o = pl.pallas_call(
        kernel,
        out_shape=(count_shape, count_shape, count_shape),
        grid_spec=pltpu.PrefetchScalarGridSpec(
            num_scalar_prefetch=0,
            grid=(B, Gi, Gj),
            in_specs=[
                pl.BlockSpec((1, Ti, D), lambda b, i, j: (b, i, 0)),
                pl.BlockSpec((1, D, Tj), lambda b, i, j: (b, 0, j)),
                pl.BlockSpec((1, Ti, 1), lambda b, i, j: (b, i, 0)),
                pl.BlockSpec((1, 1, Tj), lambda b, i, j: (b, 0, j)),
            ],
            out_specs=(count_spec, count_spec, count_spec),
        ),
        compiler_params=pltpu.CompilerParams(
            # j is the reduction axis (output accumulates across it); batch and
            # row-tile axes are independent -> usable by both TCs on v7x.
            dimension_semantics=("parallel", "parallel", "arbitrary")),
    )(xi, xj, ti, tj)

    TP = jnp.sum(tp_o[:, :, 0, 0])
    S = jnp.sum(s_o[:, :, 0, 0])     # TP + FN
    C = jnp.sum(c_o[:, :, 0, 0])     # TP + FP
    total = jnp.asarray(B * N * N, jnp.float32)

    FP = C - TP
    FN = S - TP
    TN = total - S - C + TP

    Acc = (TP + TN) / (TP + FP + TN + FN)
    Precision = TP / (TP + FP)
    Recall = TP / (TP + FN)
    F = 2.0 * (Precision * Recall) / (Precision + Recall)
    return Acc, Precision, Recall, F


def _reference(x, target):
    """Pure-JAX reference mirroring the PyTorch forward."""
    x = x.astype(jnp.float32)
    diff = x[:, :, None, :] - x[:, None, :, :]
    pred = jnp.sqrt(jnp.sum(diff * diff, axis=-1))
    t = target.astype(jnp.float32)
    gt = jnp.abs(t[:, :, None] - t[:, None, :])
    ones = jnp.ones_like(pred)
    zeros = jnp.zeros_like(pred)
    TP = jnp.sum(jnp.where((gt == 0) & (pred < 5), ones, zeros))
    TN = jnp.sum(jnp.where((gt > 0) & (pred >= 5), ones, zeros))
    FP = jnp.sum(jnp.where((gt > 0) & (pred < 5), ones, zeros))
    FN = jnp.sum(jnp.where((gt == 0) & (pred >= 5), ones, zeros))
    Acc = (TP + TN) / (TP + FP + TN + FN)
    P = TP / (TP + FP)
    R = TP / (TP + FN)
    return Acc, P, R, 2 * (P * R) / (P + R)


if __name__ == "__main__":
    key = jax.random.PRNGKey(0)
    k1, k2 = jax.random.split(key)
    B, N, D = 2, 32, 3                       # small point cloud per batch
    x = jax.random.normal(k1, (B, N, D), dtype=jnp.float32) * 3.0
    target = jax.random.randint(k2, (B, N), 0, 4, dtype=jnp.int32)

    out = leaf_metrics(x, target, dist=5.0)
    out = jax.block_until_ready(out)

    ref = jax.block_until_ready(_reference(x, target))
    np.testing.assert_allclose(np.array(out), np.array(ref), rtol=1e-5, atol=1e-5)

    print("KERNEL_OK")
</pallas_src>

<mosaic_0001>
module attributes {stable_mosaic.version = 11 : i64} {
  func.func @_leaf_metrics_kernel(%arg0: i32, %arg1: i32, %arg2: i32, %arg3: memref<1x128x3xf32, #tpu.memory_space<vmem>>, %arg4: memref<1x3x128xf32, #tpu.memory_space<vmem>>, %arg5: memref<1x128x1xf32, #tpu.memory_space<vmem>>, %arg6: memref<1x1x128xf32, #tpu.memory_space<vmem>>, %arg7: memref<1x1x8x128xf32, #tpu.memory_space<vmem>>, %arg8: memref<1x1x8x128xf32, #tpu.memory_space<vmem>>, %arg9: memref<1x1x8x128xf32, #tpu.memory_space<vmem>>) attributes {dimension_semantics = [#tpu.dimension_semantics<parallel>, #tpu.dimension_semantics<parallel>, #tpu.dimension_semantics<arbitrary>], iteration_bounds = array<i64: 2, 1, 1>, scalar_prefetch = 0 : i64, scratch_operands = 0 : i64, tpu.core_type = #tpu.core_type<tc>, window_params = [{transform_indices = @transform_0, window_bounds = array<i64: 1, 128, 3>}, {transform_indices = @transform_1, window_bounds = array<i64: 1, 3, 128>}, {transform_indices = @transform_2, window_bounds = array<i64: 1, 128, 1>}, {transform_indices = @transform_3, window_bounds = array<i64: 1, 1, 128>}, {transform_indices = @transform_4, window_bounds = array<i64: 1, 1, 8, 128>}, {transform_indices = @transform_5, window_bounds = array<i64: 1, 1, 8, 128>}, {transform_indices = @transform_6, window_bounds = array<i64: 1, 1, 8, 128>}]} {
    %c0_i32 = arith.constant 0 : i32
    %0 = arith.cmpi eq, %arg2, %c0_i32 : i32
    %1 = arith.extui %0 : i1 to i32
    %c0_i32_0 = arith.constant 0 : i32
    %2 = arith.cmpi ne, %1, %c0_i32_0 : i32
    scf.if %2 {
      %cst_42 = arith.constant 0.000000e+00 : f32
      %84 = vector.broadcast %cst_42 : f32 to vector<1x1x8x128xf32>
      %c0_43 = arith.constant 0 : index
      %c0_44 = arith.constant 0 : index
      %c0_45 = arith.constant 0 : index
      %c0_46 = arith.constant 0 : index
      %85 = vector.load %arg7[%c0_43, %c0_44, %c0_45, %c0_46] : memref<1x1x8x128xf32, #tpu.memory_space<vmem>>, vector<1x1x8x128xf32>
      tpu.vector_store %arg7[%c0_43, %c0_44, %c0_45, %c0_46], %84 {strides = array<i32>} : memref<1x1x8x128xf32, #tpu.memory_space<vmem>>, vector<1x1x8x128xf32>,
      %cst_47 = arith.constant 0.000000e+00 : f32
      %86 = vector.broadcast %cst_47 : f32 to vector<1x1x8x128xf32>
      %c0_48 = arith.constant 0 : index
      %c0_49 = arith.constant 0 : index
      %c0_50 = arith.constant 0 : index
      %c0_51 = arith.constant 0 : index
      %87 = vector.load %arg8[%c0_48, %c0_49, %c0_50, %c0_51] : memref<1x1x8x128xf32, #tpu.memory_space<vmem>>, vector<1x1x8x128xf32>
      tpu.vector_store %arg8[%c0_48, %c0_49, %c0_50, %c0_51], %86 {strides = array<i32>} : memref<1x1x8x128xf32, #tpu.memory_space<vmem>>, vector<1x1x8x128xf32>,
      %cst_52 = arith.constant 0.000000e+00 : f32
      %88 = vector.broadcast %cst_52 : f32 to vector<1x1x8x128xf32>
      %c0_53 = arith.constant 0 : index
      %c0_54 = arith.constant 0 : index
      %c0_55 = arith.constant 0 : index
      %c0_56 = arith.constant 0 : index
      %89 = vector.load %arg9[%c0_53, %c0_54, %c0_55, %c0_56] : memref<1x1x8x128xf32, #tpu.memory_space<vmem>>, vector<1x1x8x128xf32>
      tpu.vector_store %arg9[%c0_53, %c0_54, %c0_55, %c0_56], %88 {strides = array<i32>} : memref<1x1x8x128xf32, #tpu.memory_space<vmem>>, vector<1x1x8x128xf32>,
    } else {
    }
    %c0 = arith.constant 0 : index
    %c0_1 = arith.constant 0 : index
    %c0_2 = arith.constant 0 : index
    %3 = vector.load %arg3[%c0, %c0_1, %c0_2] : memref<1x128x3xf32, #tpu.memory_space<vmem>>, vector<1x128x3xf32>
    %4 = vector.shape_cast %3 : vector<1x128x3xf32> to vector<128x3xf32>
    %c0_3 = arith.constant 0 : index
    %c0_4 = arith.constant 0 : index
    %c0_5 = arith.constant 0 : index
    %5 = vector.load %arg4[%c0_3, %c0_4, %c0_5] : memref<1x3x128xf32, #tpu.memory_space<vmem>>, vector<1x3x128xf32>
    %6 = vector.shape_cast %5 : vector<1x3x128xf32> to vector<3x128xf32>
    %c0_6 = arith.constant 0 : index
    %c0_7 = arith.constant 0 : index
    %c0_8 = arith.constant 0 : index
    %7 = vector.load %arg5[%c0_6, %c0_7, %c0_8] : memref<1x128x1xf32, #tpu.memory_space<vmem>>, vector<1x128x1xf32>
    %8 = vector.shape_cast %7 : vector<1x128x1xf32> to vector<128x1xf32>
    %c0_9 = arith.constant 0 : index
    %c0_10 = arith.constant 0 : index
    %c0_11 = arith.constant 0 : index
    %9 = vector.load %arg6[%c0_9, %c0_10, %c0_11] : memref<1x1x128xf32, #tpu.memory_space<vmem>>, vector<1x1x128xf32>
    %10 = vector.shape_cast %9 : vector<1x1x128xf32> to vector<1x128xf32>
    %cst = arith.constant 0.000000e+00 : f32
    %11 = vector.broadcast %cst : f32 to vector<128x128xf32>
    %12 = vector.extract_strided_slice %4 {offsets = [0, 0], sizes = [128, 1], strides = [1, 1]} : vector<128x3xf32> to vector<128x1xf32>
    %13 = vector.extract_strided_slice %6 {offsets = [0, 0], sizes = [1, 128], strides = [1, 1]} : vector<3x128xf32> to vector<1x128xf32>
    %14 = vector.broadcast %12 : vector<128x1xf32> to vector<128x128xf32>
    %15 = vector.broadcast %13 : vector<1x128xf32> to vector<128x128xf32>
    %16 = arith.subf %14, %15 : vector<128x128xf32>
    %17 = arith.mulf %16, %16 : vector<128x128xf32>
    %18 = arith.addf %11, %17 : vector<128x128xf32>
    %19 = vector.extract_strided_slice %4 {offsets = [0, 1], sizes = [128, 1], strides = [1, 1]} : vector<128x3xf32> to vector<128x1xf32>
    %20 = vector.extract_strided_slice %6 {offsets = [1, 0], sizes = [1, 128], strides = [1, 1]} : vector<3x128xf32> to vector<1x128xf32>
    %21 = vector.broadcast %19 : vector<128x1xf32> to vector<128x128xf32>
    %22 = vector.broadcast %20 : vector<1x128xf32> to vector<128x128xf32>
    %23 = arith.subf %21, %22 : vector<128x128xf32>
    %24 = arith.mulf %23, %23 : vector<128x128xf32>
    %25 = arith.addf %18, %24 : vector<128x128xf32>
    %26 = vector.extract_strided_slice %4 {offsets = [0, 2], sizes = [128, 1], strides = [1, 1]} : vector<128x3xf32> to vector<128x1xf32>
    %27 = vector.extract_strided_slice %6 {offsets = [2, 0], sizes = [1, 128], strides = [1, 1]} : vector<3x128xf32> to vector<1x128xf32>
    %28 = vector.broadcast %26 : vector<128x1xf32> to vector<128x128xf32>
    %29 = vector.broadcast %27 : vector<1x128xf32> to vector<128x128xf32>
    %30 = arith.subf %28, %29 : vector<128x128xf32>
    %31 = arith.mulf %30, %30 : vector<128x128xf32>
    %32 = arith.addf %25, %31 : vector<128x128xf32>
    %33 = vector.broadcast %8 : vector<128x1xf32> to vector<128x128xf32>
    %34 = vector.broadcast %10 : vector<1x128xf32> to vector<128x128xf32>
    %35 = arith.cmpf oeq, %33, %34 : vector<128x128xf32>
    %cst_12 = arith.constant 2.500000e+01 : f32
    %36 = vector.broadcast %cst_12 : f32 to vector<128x128xf32>
    %37 = arith.cmpf olt, %32, %36 : vector<128x128xf32>
    %38 = tpu.iota {dimensions = array<i32: 0>} : vector<128x128xi32>
    %c128_i32 = arith.constant 128 : i32
    %39 = arith.muli %arg1, %c128_i32 : i32
    %40 = vector.broadcast %39 : i32 to vector<128x128xi32>
    %41 = arith.addi %38, %40 : vector<128x128xi32>
    %42 = tpu.iota {dimensions = array<i32: 1>} : vector<128x128xi32>
    %c128_i32_13 = arith.constant 128 : i32
    %43 = arith.muli %arg2, %c128_i32_13 : i32
    %44 = vector.broadcast %43 : i32 to vector<128x128xi32>
    %45 = arith.addi %42, %44 : vector<128x128xi32>
    %c32_i32 = arith.constant 32 : i32
    %46 = vector.broadcast %c32_i32 : i32 to vector<128x128xi32>
    %47 = arith.cmpi slt, %41, %46 : vector<128x128xi32>
    %c32_i32_14 = arith.constant 32 : i32
    %48 = vector.broadcast %c32_i32_14 : i32 to vector<128x128xi32>
    %49 = arith.cmpi slt, %45, %48 : vector<128x128xi32>
    %50 = arith.andi %47, %49 : vector<128x128xi1>
    %51 = arith.andi %35, %50 : vector<128x128xi1>
    %52 = arith.andi %37, %50 : vector<128x128xi1>
    %53 = arith.andi %51, %37 : vector<128x128xi1>
    %54 = arith.extui %53 : vector<128x128xi1> to vector<128x128xi32>
    %55 = arith.sitofp %54 : vector<128x128xi32> to vector<128x128xf32>
    %56 = vector.shape_cast %55 : vector<128x128xf32> to vector<1x128x128xf32>
    %cst_15 = arith.constant dense<0.000000e+00> : vector<1xf32>
    %57 = vector.multi_reduction <add>, %56, %cst_15 [1, 2] : vector<1x128x128xf32> to vector<1xf32>
    %58 = vector.shape_cast %57 : vector<1xf32> to vector<1x1x1xf32>
    %59 = vector.extract %58[0, 0, 0] : f32 from vector<1x1x1xf32>
    %60 = arith.extui %51 : vector<128x128xi1> to vector<128x128xi32>
    %61 = arith.sitofp %60 : vector<128x128xi32> to vector<128x128xf32>
    %62 = vector.shape_cast %61 : vector<128x128xf32> to vector<1x128x128xf32>
    %cst_16 = arith.constant dense<0.000000e+00> : vector<1xf32>
    %63 = vector.multi_reduction <add>, %62, %cst_16 [1, 2] : vector<1x128x128xf32> to vector<1xf32>
    %64 = vector.shape_cast %63 : vector<1xf32> to vector<1x1x1xf32>
    %65 = vector.extract %64[0, 0, 0] : f32 from vector<1x1x1xf32>
    %66 = arith.extui %52 : vector<128x128xi1> to vector<128x128xi32>
    %67 = arith.sitofp %66 : vector<128x128xi32> to vector<128x128xf32>
    %68 = vector.shape_cast %67 : vector<128x128xf32> to vector<1x128x128xf32>
    %cst_17 = arith.constant dense<0.000000e+00> : vector<1xf32>
    %69 = vector.multi_reduction <add>, %68, %cst_17 [1, 2] : vector<1x128x128xf32> to vector<1xf32>
    %70 = vector.shape_cast %69 : vector<1xf32> to vector<1x1x1xf32>
    %71 = vector.extract %70[0, 0, 0] : f32 from vector<1x1x1xf32>
    %c0_18 = arith.constant 0 : index
    %c0_19 = arith.constant 0 : index
    %c0_20 = arith.constant 0 : index
    %c0_21 = arith.constant 0 : index
    %72 = vector.load %arg7[%c0_18, %c0_19, %c0_20, %c0_21] : memref<1x1x8x128xf32, #tpu.memory_space<vmem>>, vector<1x1x8x128xf32>
    %73 = vector.broadcast %59 : f32 to vector<1x1x8x128xf32>
    %74 = arith.addf %72, %73 : vector<1x1x8x128xf32>
    %c0_22 = arith.constant 0 : index
    %c0_23 = arith.constant 0 : index
    %c0_24 = arith.constant 0 : index
    %c0_25 = arith.constant 0 : index
    %75 = vector.load %arg7[%c0_22, %c0_23, %c0_24, %c0_25] : memref<1x1x8x128xf32, #tpu.memory_space<vmem>>, vector<1x1x8x128xf32>
    tpu.vector_store %arg7[%c0_22, %c0_23, %c0_24, %c0_25], %74 {strides = array<i32>} : memref<1x1x8x128xf32, #tpu.memory_space<vmem>>, vector<1x1x8x128xf32>,
    %c0_26 = arith.constant 0 : index
    %c0_27 = arith.constant 0 : index
    %c0_28 = arith.constant 0 : index
    %c0_29 = arith.constant 0 : index
    %76 = vector.load %arg8[%c0_26, %c0_27, %c0_28, %c0_29] : memref<1x1x8x128xf32, #tpu.memory_space<vmem>>, vector<1x1x8x128xf32>
    %77 = vector.broadcast %65 : f32 to vector<1x1x8x128xf32>
    %78 = arith.addf %76, %77 : vector<1x1x8x128xf32>
    %c0_30 = arith.constant 0 : index
    %c0_31 = arith.constant 0 : index
    %c0_32 = arith.constant 0 : index
    %c0_33 = arith.constant 0 : index
    %79 = vector.load %arg8[%c0_30, %c0_31, %c0_32, %c0_33] : memref<1x1x8x128xf32, #tpu.memory_space<vmem>>, vector<1x1x8x128xf32>
    tpu.vector_store %arg8[%c0_30, %c0_31, %c0_32, %c0_33], %78 {strides = array<i32>} : memref<1x1x8x128xf32, #tpu.memory_space<vmem>>, vector<1x1x8x128xf32>,
    %c0_34 = arith.constant 0 : index
    %c0_35 = arith.constant 0 : index
    %c0_36 = arith.constant 0 : index
    %c0_37 = arith.constant 0 : index
    %80 = vector.load %arg9[%c0_34, %c0_35, %c0_36, %c0_37] : memref<1x1x8x128xf32, #tpu.memory_space<vmem>>, vector<1x1x8x128xf32>
    %81 = vector.broadcast %71 : f32 to vector<1x1x8x128xf32>
    %82 = arith.addf %80, %81 : vector<1x1x8x128xf32>
    %c0_38 = arith.constant 0 : index
    %c0_39 = arith.constant 0 : index
    %c0_40 = arith.constant 0 : index
    %c0_41 = arith.constant 0 : index
    %83 = vector.load %arg9[%c0_38, %c0_39, %c0_40, %c0_41] : memref<1x1x8x128xf32, #tpu.memory_space<vmem>>, vector<1x1x8x128xf32>
    tpu.vector_store %arg9[%c0_38, %c0_39, %c0_40, %c0_41], %82 {strides = array<i32>} : memref<1x1x8x128xf32, #tpu.memory_space<vmem>>, vector<1x1x8x128xf32>,
    return
  }
  func.func @transform_0(%arg0: i32, %arg1: i32, %arg2: i32) -> (i32, i32, i32) {
    %c0_i32 = arith.constant 0 : i32
    %c0_i32_0 = arith.constant 0 : i32
    return %arg0, %arg1, %c0_i32 : i32, i32, i32
  }
  func.func @transform_1(%arg0: i32, %arg1: i32, %arg2: i32) -> (i32, i32, i32) {
    %c0_i32 = arith.constant 0 : i32
    %c0_i32_0 = arith.constant 0 : i32
    return %arg0, %c0_i32, %arg2 : i32, i32, i32
  }
  func.func @transform_2(%arg0: i32, %arg1: i32, %arg2: i32) -> (i32, i32, i32) {
    %c0_i32 = arith.constant 0 : i32
    %c0_i32_0 = arith.constant 0 : i32
    return %arg0, %arg1, %c0_i32 : i32, i32, i32
  }
  func.func @transform_3(%arg0: i32, %arg1: i32, %arg2: i32) -> (i32, i32, i32) {
    %c0_i32 = arith.constant 0 : i32
    %c0_i32_0 = arith.constant 0 : i32
    return %arg0, %c0_i32, %arg2 : i32, i32, i32
  }
  func.func @transform_4(%arg0: i32, %arg1: i32, %arg2: i32) -> (i32, i32, i32, i32) {
    %c0_i32 = arith.constant 0 : i32
    %c0_i32_0 = arith.constant 0 : i32
    %c0_i32_1 = arith.constant 0 : i32
    return %arg0, %arg1, %c0_i32, %c0_i32_0 : i32, i32, i32, i32
  }
  func.func @transform_5(%arg0: i32, %arg1: i32, %arg2: i32) -> (i32, i32, i32, i32) {
    %c0_i32 = arith.constant 0 : i32
    %c0_i32_0 = arith.constant 0 : i32
    %c0_i32_1 = arith.constant 0 : i32
    return %arg0, %arg1, %c0_i32, %c0_i32_0 : i32, i32, i32, i32
  }
  func.func @transform_6(%arg0: i32, %arg1: i32, %arg2: i32) -> (i32, i32, i32, i32) {
    %c0_i32 = arith.constant 0 : i32
    %c0_i32_0 = arith.constant 0 : i32
    %c0_i32_1 = arith.constant 0 : i32
    return %arg0, %arg1, %c0_i32, %c0_i32_0 : i32, i32, i32, i32
  }
}

</mosaic_0001>

<bundles_post_ra>
// kernel: tpu_custom_call.1
= control target key start
LH: loop header
LB: loop body
LE: loop exit
PB: predicated region body
PF: predicated region fallthrough
CT: control target
= control target key end

     0   :  { %s2023_s0 = inlined_call_operand.vmem [shape: f32[2,128,3], index: 0, kind: input, shape index: {}]   ;;  %s2024_s1 = inlined_call_operand.vmem [shape: f32[2,3,128], index: 1, kind: input, shape index: {}]   ;;  %s2025_s2 = inlined_call_operand.vmem [shape: f32[2,128,1], index: 2, kind: input, shape index: {}]   ;;  %s2026_s3 = inlined_call_operand.vmem [shape: f32[2,1,128], index: 3, kind: input, shape index: {}]   ;;  %s2027_s4 = inlined_call_operand.hbm [shape: f32[2,1,8,128], index: 4, kind: output, shape index: {0}]   ;;  %s2028_s5 = inlined_call_operand.hbm [shape: f32[2,1,8,128], index: 5, kind: output, shape index: {1}]   ;;  %s2029_s6 = inlined_call_operand.hbm [shape: f32[2,1,8,128], index: 6, kind: output, shape index: {2}]  }
   0x1   :  { %2033 = sst [smem:[#allocation10_spill]] %s2023_s0 }
   0x2   :  { %2034 = sst [smem:[#allocation11_spill]] %s2024_s1 }
   0x3   :  { %2035 = sst [smem:[#allocation12_spill]] %s2025_s2 }
   0x4   :  { %2036 = sst [smem:[#allocation13_spill]] %s2026_s3 }
   0x5   :  { %12 = vsyncpa [#allocation3], 0 }
   0x6   :  { %14 = vsyncpa [#allocation3 + $0x1], 0 }
   0x7   :  { %15 = vsyncpa [#allocation5], 0 }
   0x8   :  { %17 = vsyncpa [#allocation5 + $0x1], 0  ;;  %s1762_s21 = smov 0   ;;  %s1764_s22 = smov 0  }
   0x9   :  { %s1766_s23 = smov 0   ;;  %s1768_s24 = smov 0  }
   0xa   :  { %s1770_s25 = smov 0   ;;  %s1772_s26 = smov 0  }
   0xb LB: > { %s1460_s27 = sadd.s32 4294967295, %s1718_s26   ;;  %s2030_s28 = sadd.s32 4294967294, %s1718_s26   ;;  %s1718_s26 = sphi %s1772_s26, %s23_s26   ;;  %s1714_s25 = sphi %s1770_s25, %s2063_s25   ;;  %s1710_s24 = sphi %s1768_s24, %s2062_s24   ;;  %s1706_s23 = sphi %s1766_s23, %s2061_s23   ;;  %s1702_s22 = sphi %s1764_s22, %s2060_s22   ;;  %s1698_s21 = sphi %s1762_s21, %s2059_s21  }
   0xc   : > { %s42_s29 = sadd.s32 1, %s1714_s25  ;;  %s163_s30 = sadd.s32 1, %s1706_s23 }
   0xd   : > { %p44_p0 = scmp.ge.s32.totalorder %s42_s29, 2  ;;  %p173_p1 = scmp.ne.s32.totalorder %s1706_s23, %s1702_s22 }
   0xe   : > { %p174_p2 = scmp.eq.s32.totalorder %s1460_s27, 1  ;;  %p179_p3 = scmp.ne.s32.totalorder %s1702_s22, %s1698_s21 }
   0xf   : > { %s2065_s29 = smov (%p44_p0, %s42_s29), 0  ;;  %p180_p5 = scmp.eq.s32.totalorder %s2030_s28, 1 }
  0x10   : > { %2037 = sst [smem:[#allocation9_spill]] %s2065_s29  ;;  %p1804_p4 = por %p174_p2, %p173_p1 }
  0x11   : > { %s158_s8 = ssub.s32 %s1714_s25, %s2065_s29  ;;  %p1464_p6 = scmp.ge.s32.totalorder %s1718_s26, 1 }
  0x12   : > { %p161_p7 = scmp.eq.s32.totalorder %s158_s8, 0  ;;  %p1813_p8 = por %p180_p5, %p179_p3 }
  0x13   : > { %p299_p9 = scmp.lt.s32.totalorder %s1718_s26, 3 }
  0x14   : > { %s1819_s10 = scalar_select %p161_p7, %s1706_s23, %s163_s30  }
  0x15   : > { %p300_p10 = pnand %p1464_p6, %p299_p9 }
  0x16   : > { %p366_p11 = scmp.lt.s32.totalorder (!%p300_p10), %s1710_s24, 1  ;;  %v1720_v0 = vmov (!%p300_p10), 1   ;;  %v1721_v1 = vmov (!%p300_p10), 0   ;;  %s2040_s0 = sld [smem:[#allocation10_spill]] (!%p300_p10)  ;;  %v1722_v5 = vmov (!%p300_p10), 2   ;;  %v519_v11 = vlaneseq (!%p300_p10) }
  0x17   : > { %303 = sbr.rel (%p300_p10) target bundleno = 474 (0x1da), region = 36  ;;  %1572 = vset.pattern.permute.xlu1 (!%p300_p10), %v1720_v0  ;;  %1571 = vset.pattern.permute.xlu0 (!%p300_p10), %v1721_v1  ;;  %s2041_s2 = sld [smem:[#allocation12_spill]] (!%p300_p10) }
  0x18   : > { %v520_v14 = vshrl.u32 (!%p300_p10), %v519_v11, 7  ;;  %s2042_s1 = sld [smem:[#allocation11_spill]] (!%p300_p10)  ;;  %s2043_s3 = sld [smem:[#allocation13_spill]] (!%p300_p10)  ;;  %v957_v53 = vand.u32 (!%p300_p10), 127, %v519_v11 }
  0x19   : > { %s1897_s16 = sand.u32 (!%p300_p10), 1, %s1460_s27   ;;  %s1489_s17 = sshll.u32 (!%p300_p10), %s1710_s24, 7 }
  0x1a   : > { %v637_v17 = vsub.s32 (!%p300_p10), 1, %v520_v14  ;;  %v521_v18 = vsub.s32 (!%p300_p10), 0, %v520_v14  ;;  %v753_v20 = vsub.s32 (!%p300_p10), 2, %v520_v14  ;;  %vm977_vm2 = vcmp.lt.s32.totalorder (!%p300_p10), %v957_v53, 32  ;;  %s1903_s20 = scalar_lea.hbm (!%p300_p10), %s2028_s5, %s1489_s17 }
  0x1e   : > { %s1823_s11 = scalar_select %p366_p11, %s1710_s24, 1 }
  0x1f   : > { %s1913_s24 = scalar_lea.hbm %s2027_s4, %s1489_s17 }
  0x20   : > { %s1494_s12 = sshll.u32 %s1823_s11, 7  ;;  %s1470_s19 = sshll.u32 %s1823_s11, 2 }
  0x21   : > { %s373_s15 = scalar_lea.vmem %s2040_s0, %s1494_s12  ;;  %s390_s18 = scalar_lea.vmem %s2041_s2, %s1494_s12 }
  0x22   : > { %v405_v2 = vld [vmem:[%s373_s15] sm:$0xff]  ;;  %v406_v3 = vld [vmem:[%s373_s15 + $0x8] sm:$0xff]  ;;  %v407_v4 = vld [vmem:[%s373_s15 + $0x10] sm:$0xff]  ;;  %s381_s8 = scalar_lea.vmem %s2042_s1, %s1470_s19  ;;  %s397_s14 = scalar_lea.vmem %s2043_s3, %s1823_s11 }
  0x23   : > { %572 = vperm.xlu1 %1572, %v405_v2   ;;  %441 = vperm.xlu0 %1571, %v405_v2   ;;  %v408_v6 = vld [vmem:[%s373_s15 + $0x18] sm:$0xff]  ;;  %v422_v7 = vld [vmem:[%s390_s18] sm:$0xff]  ;;  %v423_v9 = vld [vmem:[%s390_s18 + $0x8] sm:$0xff]  ;;  %s348_s11 = sand.u32 1, %s1702_s22  }
  0x24   : > { %v425_v8 = vld [vmem:[%s390_s18 + $0x18] sm:$0xff]  ;;  %v424_v10 = vld [vmem:[%s390_s18 + $0x10] sm:$0xff]  ;;  %v421_v19 = vld [vmem:[%s381_s8] sm:$0x7]  ;;  %s1893_s15 = sshll.u32 %s348_s11, 3  ;;  %s1223_s2 = scalar_lea.sflag [#allocation3], %s348_s11 }
  0x25   : > { %v638_v23 = vrot.slane %v421_v19, %v637_v17  ;;  %v522_v24 = vrot.slane %v421_v19, %v521_v18  ;;  %v754_v25 = vrot.slane %v421_v19, %v753_v20  ;;  %v1473_v52 = vld [vmem:[%s397_s14] ss:$0 sm:$0xff]  ;;  %s357_s30 = scalar_lea.vmem [#allocation4], %s1893_s15  ;;  %s350_s12 = scalar_lea.vmem [#allocation2], %s1893_s15 }
  0x26   : > { %s1261_s8 = sshll.u32 %s357_s30, 4  ;;  %s1247_s13 = sshll.u32 %s350_s12, 4  ;;  %s1915_s13 = int_to_ptr.vmem [resolvable:$true] %s1247_s13  ;;  %s1919_s8 = int_to_ptr.vmem [resolvable:$true] %s1261_s8 }
  0x27   : > { %576 = vperm.xlu1 %1572, %v406_v3   ;;  %446 = vperm.xlu0 %1571, %v406_v3   ;;  %s2031_s0 = scalar_lea.vmem [#allocation6], %s1893_s15  ;;  %s1580_s27 = scalar_lea.vmem %s1915_s13, 128 }
  0x28   : > { %s1275_s1 = sshll.u32 %s2031_s0, 4  ;;  %p1581_p12 = scmp.ne.s32.totalorder %s1915_s13, %s1580_s27  ;;  %s1927_s1 = int_to_ptr.vmem [resolvable:$true] %s1275_s1 }
  0x29   : > { %s1724_s0 = smov [#allocation2]  }
  0x2a   : > { %p1582_p13 = pnand %p1581_p12, %p1804_p4  ;;  %s1584_s3 = sshll.u32 %s1724_s0, 4  ;;  %s1585_s3 = int_to_ptr.vmem [resolvable:$false] %s1584_s3 }
  0x2b   : > { %580 = vperm.xlu1 %1572, %v407_v4   ;;  %451 = vperm.xlu0 %1571, %v407_v4   ;;  %s1586_s29 = scalar_lea.vmem %s1585_s3, 256  ;;  %p1587_p1 = scmp.lt.s32.totalorder %s1915_s13, %s1585_s3 }
  0x2c   : > { %p1583_p0 = pneg %p1582_p13  ;;  %p1588_p2 = scmp.lt.s32.totalorder %s1586_s29, %s1580_s27 }
  0x2e   : > { %p1589_p3 = por %p1588_p2, %p1587_p1 }
  0x2f   : > { %1574 = vset.pattern.permute.xlu1 %v1722_v5  ;;  %1573 = vset.pattern.permute.xlu0 %v1722_v5 }
  0x30   : > { %692 = vperm.xlu1 %1574, %v406_v3   ;;  %688 = vperm.xlu0 %1573, %v405_v2   ;;  %p1590_p5 = pnand %p1589_p3, %p1583_p0 }
  0x34   : > { %1575 = vset.pattern.permute.xlu1 %v1721_v1  ;;  %1576 = vset.pattern.permute.xlu0 %v1720_v0 }
  0x35   : > { %456 = vperm.xlu1 %1575, %v408_v6   ;;  %584 = vperm.xlu0 %1576, %v408_v6  }
  0x39   : > { %1577 = vset.pattern.permute.xlu1 %v1722_v5  ;;  %1578 = vset.pattern.permute.xlu0 %v1721_v1 }
  0x3a   : > { %696 = vperm.xlu1 %1577, %v407_v4   ;;  %805 = vperm.xlu0 %1578, %v422_v7  }
  0x3e   : > { %700 = vperm.xlu1 %1577, %v408_v6   ;;  %820 = vperm.xlu0 %1578, %v425_v8  }
  0x42   : > { %1579 = vset.pattern.permute.xlu1 %v1721_v1 }
  0x43   : > { %810 = vperm.xlu1 %1579, %v423_v9   ;;  %v1723_v9 = vmov 0.0  }
  0x47   : > { %815 = vperm.xlu1 %1579, %v424_v10  }
  0xa2   : > { %v573_v12 = vpop.permute.xlu1 %572  ;;  %v442_v13 = vpop.permute.xlu0 %441 }
  0xa3   : > { %v639_v26 = vsub.f32 %v573_v12, %v638_v23  ;;  %v523_v27 = vsub.f32 %v442_v13, %v522_v24 }
  0xa5   : > { %v655_v34 = vmul.f32 %v639_v26, %v639_v26  ;;  %v539_v35 = vmul.f32 %v523_v27, %v523_v27 }
  0xa6   : > { %v577_v15 = vpop.permute.xlu1 %576  ;;  %v447_v16 = vpop.permute.xlu0 %446 }
  0xa7   : > { %v640_v30 = vsub.f32 %v577_v15, %v638_v23  ;;  %v524_v31 = vsub.f32 %v447_v16, %v522_v24  ;;  %v671_v44 = vadd.f32 %v655_v34, %v539_v35 }
  0xa9   : > { %v656_v36 = vmul.f32 %v640_v30, %v640_v30  ;;  %v540_v37 = vmul.f32 %v524_v31, %v524_v31 }
  0xaa   : > { %v581_v21 = vpop.permute.xlu1 %580  ;;  %v452_v22 = vpop.permute.xlu0 %451 }
  0xab   : > { %v641_v40 = vsub.f32 %v581_v21, %v638_v23  ;;  %v525_v41 = vsub.f32 %v452_v22, %v522_v24  ;;  %v672_v45 = vadd.f32 %v656_v36, %v540_v37 }
  0xad   : > { %v657_v48 = vmul.f32 %v641_v40, %v641_v40  ;;  %v541_v49 = vmul.f32 %v525_v41, %v525_v41 }
  0xaf   : > { %v693_v28 = vpop.permute.xlu1 %692  ;;  %v689_v29 = vpop.permute.xlu0 %688  ;;  %v673_v60 = vadd.f32 %v657_v48, %v541_v49 }
  0xb0   : > { %v755_v32 = vsub.f32 %v689_v29, %v754_v25  ;;  %v756_v33 = vsub.f32 %v693_v28, %v754_v25 }
  0xb2   : > { %v771_v42 = vmul.f32 %v755_v32, %v755_v32  ;;  %v772_v43 = vmul.f32 %v756_v33, %v756_v33 }
  0xb4   : > { %v457_v38 = vpop.permute.xlu1 %456  ;;  %v585_v39 = vpop.permute.xlu0 %584  ;;  %v787_v50 = vadd.f32 %v771_v42, %v671_v44  ;;  %v788_v55 = vadd.f32 %v772_v43, %v672_v45 }
  0xb5   : > { %v526_v46 = vsub.f32 %v457_v38, %v522_v24  ;;  %v642_v47 = vsub.f32 %v585_v39, %v638_v23 }
  0xb6   : > { %vm905_vm1 = vcmp.lt.f32.partialorder %v787_v50, 25.0  ;;  %vm906_vm3 = vcmp.lt.f32.partialorder %v788_v55, 25.0 }
  0xb7   : > { %v542_v57 = vmul.f32 %v526_v46, %v526_v46  ;;  %v658_v58 = vmul.f32 %v642_v47, %v642_v47  ;;  %vm1842_vm5 = vmand %vm905_vm1, %vm977_vm2 }
  0xb8   : > { %vm1848_vm7 = vmand %vm906_vm3, %vm977_vm2  ;;  %v1482_v18 = vsel %vm1842_vm5, 1.0, %v1723_v9 }
  0xb9   : > { %v697_v51 = vpop.permute.xlu1 %696  ;;  %v806_v54 = vpop.permute.xlu0 %805  ;;  %v674_v1 = vadd.f32 %v658_v58, %v542_v57  ;;  %v1483_v20 = vsel %vm1848_vm7, 1.0, %v1723_v9 }
  0xba   : > { %v757_v56 = vsub.f32 %v697_v51, %v754_v25  ;;  %vm889_vm0 = vcmp.eq.f32.partialorder %v806_v54, %v1473_v52  ;;  %v1186_v29 = vadd.f32 %v1483_v20, %v1482_v18 }
  0xbb   : > { %vm994_vm4 = vmand %vm889_vm0, %vm977_vm2 }
  0xbc   : > { %v773_v59 = vmul.f32 %v757_v56, %v757_v56  ;;  %vm1852_vm8 = vmand %vm994_vm4, %vm905_vm1  ;;  %v1478_v10 = vsel %vm994_vm4, 1.0, %v1723_v9 }
  0xbd   : > { %v701_v61 = vpop.permute.xlu1 %700  ;;  %v821_v62 = vpop.permute.xlu0 %820  ;;  %v1474_v16 = vsel %vm1852_vm8, 1.0, %v1723_v9 }
  0xbe   : > { %v758_v63 = vsub.f32 %v701_v61, %v754_v25  ;;  %v789_v0 = vadd.f32 %v773_v59, %v673_v60  ;;  %vm892_vm6 = vcmp.eq.f32.partialorder %v821_v62, %v1473_v52 }
  0xbf   : > { %vm1857_vm10 = vmand %vm892_vm6, %vm977_vm2 }
  0xc0   : > { %v774_v3 = vmul.f32 %v758_v63, %v758_v63  ;;  %vm907_vm11 = vcmp.lt.f32.partialorder %v789_v0, 25.0  ;;  %v1481_v24 = vsel %vm1857_vm10, 1.0, %v1723_v9 }
  0xc1   : > { %vm1865_vm15 = vmand %vm907_vm11, %vm977_vm2 }
  0xc2   : > { %v790_v6 = vadd.f32 %v774_v3, %v674_v1  ;;  %v811_v7 = vpop.permute.xlu1 %810  ;;  %v1484_v26 = vsel %vm1865_vm15, 1.0, %v1723_v9 }
  0xc3   : > { %vm890_vm9 = vcmp.eq.f32.partialorder %v811_v7, %v1473_v52  ;;  %v1187_v32 = vadd.f32 %v1484_v26, %v1186_v29 }
  0xc4   : > { %vm995_vm12 = vmand %vm890_vm9, %vm977_vm2  ;;  %vm908_vm13 = vcmp.lt.f32.partialorder %v790_v6, 25.0 }
  0xc5   : > { %vm1027_vm14 = vmand %vm995_vm12, %vm906_vm3  ;;  %v1479_v11 = vsel %vm995_vm12, 1.0, %v1723_v9 }
  0xc6   : > { %v1475_v12 = vsel %vm1027_vm14, 1.0, %v1723_v9  ;;  %v816_v13 = vpop.permute.xlu1 %815  ;;  %vm1872_vm0 = vmand %vm1857_vm10, %vm908_vm13  ;;  %v1130_v17 = vadd.f32 %v1479_v11, %v1478_v10 }
  0xc7   : > { %vm891_vm1 = vcmp.eq.f32.partialorder %v816_v13, %v1473_v52  ;;  %v1074_v19 = vadd.f32 %v1475_v12, %v1474_v16  ;;  %vm1013_vm6 = vmand %vm908_vm13, %vm977_vm2  ;;  %v1477_v28 = vsel %vm1872_vm0, 1.0, %v1723_v9 }
  0xc8   : > { %vm996_vm3 = vmand %vm891_vm1, %vm977_vm2  ;;  %v1485_v31 = vsel %vm1013_vm6, 1.0, %v1723_v9 }
  0xc9   : > { %vm1028_vm4 = vmand %vm996_vm3, %vm907_vm11  ;;  %v1480_v21 = vsel %vm996_vm3, 1.0, %v1723_v9  ;;  %v1188_v33 = vadd.f32 %v1485_v31, %v1187_v32 }
  0xca   : > { %v1476_v22 = vsel %vm1028_vm4, 1.0, %v1723_v9  ;;  %v1131_v23 = vadd.f32 %v1480_v21, %v1130_v17 }
  0xcb   : > { %v1075_v25 = vadd.f32 %v1476_v22, %v1074_v19 }
  0xcc   : > { %v1132_v27 = vadd.f32 %v1481_v24, %v1131_v23 }
  0xcd   : > { %v1076_v30 = vadd.f32 %v1477_v28, %v1075_v25 }
  0xce   : > { %1145 = vadd.xlane.f32.xlu0 %v1132_v27 }
  0xcf   : > { %1089 = vadd.xlane.f32.xlu1 %v1076_v30 }
  0xd2   : > { %1201 = vadd.xlane.f32.xlu0 %v1188_v33 }
 0x15b   : > { %v1146_v34 = vpop.xlane.xlu0 %1145 }
 0x15c   : > { %v1147_v35 = vrot.slane %v1146_v34, 4  ;;  %v1090_v36 = vpop.xlane.xlu1 %1089 }
 0x15d   : > { %v1091_v37 = vrot.slane %v1090_v36, 4 }
 0x15e   : > { %v1148_v38 = vadd.f32 %v1147_v35, %v1146_v34 }
 0x15f   : > { %v1092_v39 = vadd.f32 %v1091_v37, %v1090_v36  ;;  %v1202_v40 = vpop.xlane.xlu0 %1201 }
 0x160   : > { %v1149_v41 = vrot.slane %v1148_v38, 2  ;;  %v1203_v42 = vrot.slane %v1202_v40, 4 }
 0x161   : > { %v1093_v43 = vrot.slane %v1092_v39, 2 }
 0x162   : > { %v1204_v44 = vadd.f32 %v1203_v42, %v1202_v40  ;;  %v1150_v45 = vadd.f32 %v1149_v41, %v1148_v38 }
 0x163   : > { %v1094_v46 = vadd.f32 %v1093_v43, %v1092_v39 }
 0x164   : > { %v1205_v47 = vrot.slane %v1204_v44, 2  ;;  %v1151_v48 = vrot.slane %v1150_v45, 1 }
 0x165   : > { %v1095_v49 = vrot.slane %v1094_v46, 1 }
 0x166   : > { %v1206_v50 = vadd.f32 %v1205_v47, %v1204_v44  ;;  %v1152_v51 = vadd.f32 %v1151_v48, %v1150_v45 }
 0x167   : > { %v1096_v52 = vadd.f32 %v1095_v49, %v1094_v46 }
 0x168   : > { %v1207_v53 = vrot.slane %v1206_v50, 1 }
 0x169   : > { %1496 = vpush %v1096_v52 }
 0x16a   : > { %1498 = vpush %v1152_v51  ;;  %v1208_v54 = vadd.f32 %v1207_v53, %v1206_v50 }
 0x16c   : > { %1500 = vpush %v1208_v54 }
 0x19a   : > { %s1497_s14 = spop %1496 }
 0x19b   : > { %v1211_v55 = vstv %s1497_s14  ;;  %s1499_s28 = spop %1498 }
 0x19c   : > { %v1215_v56 = vstv %s1499_s28  ;;  %1213 = vst [vmem:[%s350_s12] sm:$0xff] %v1211_v55  ;;  %s1925_s28 = scalar_lea.hbm %s2029_s6, %s1489_s17 }
 0x19d   : > { %s1917_s18 = spop %1500  ;;  %1217 = vst [vmem:[%s357_s30] sm:$0xff] %v1215_v56 }
 0x19e   : > { %v1219_v57 = vstv %s1917_s18 }
 0x19f   : > { %1593 = shalt.err (!%p1590_p5)
}
 0x1a0   : > { %s1594_s11 = scalar_lea.hbm %s1913_s24, 128  ;;  %s1598_s0 = scalar_lea.hbm %s2027_s4, 256 }
 0x1a1   : > { %p1595_p6 = scmp.ne.s32.totalorder %s1913_s24, %s1594_s11  ;;  %p1599_p10 = scmp.lt.u32.totalorder %s1913_s24, %s2027_s4 }
 0x1a2   : > { %p1600_p11 = scmp.lt.u32.totalorder %s1598_s0, %s1594_s11  ;;  %p1602_p13 = scmp.lt.u32.totalorder %s1594_s11, %s1913_s24 }
 0x1a3   : > { %p1596_p7 = pnand %p1595_p6, %p1804_p4 }
 0x1a4   : > { %p1601_p12 = por %p1600_p11, %p1599_p10 }
 0x1a5   : > { %p1597_p9 = pneg %p1596_p7 }
 0x1a6   : > { %p1603_p0 = por %p1602_p13, %p1601_p12 }
 0x1a8   : > { %p1604_p1 = pnand %p1603_p0, %p1597_p9 }
 0x1aa   : > { %1607 = shalt.err (!%p1604_p1)
}
 0x1ab   : > { %1502 = dma.vmem_to_hbm [thread:$0]  (%p1804_p4), %s1915_s13, 128, %s1913_s24, %s1223_s2  }
 0x1ac   : > { %s1228_s29 = scalar_lea.sflag [#allocation5], %s1897_s16  ;;  %s1608_s18 = scalar_lea.vmem %s1919_s8, 128 }
 0x1ad   : > { %p1609_p2 = scmp.ne.s32.totalorder %s1919_s8, %s1608_s18  ;;  %s1725_s19 = smov [#allocation4]  }
 0x1ae   : > { %s1612_s14 = sshll.u32 %s1725_s19, 4  ;;  %s1613_s14 = int_to_ptr.vmem [resolvable:$false] %s1612_s14 }
 0x1af   : > { %p1610_p3 = pnand %p1609_p2, %p1804_p4  ;;  %s1614_s27 = scalar_lea.vmem %s1613_s14, 256 }
 0x1b0   : > { %p1615_p6 = scmp.lt.s32.totalorder %s1919_s8, %s1613_s14  ;;  %p1616_p7 = scmp.lt.s32.totalorder %s1614_s27, %s1608_s18 }
 0x1b1   : > { %p1611_p5 = pneg %p1610_p3 }
 0x1b2   : > { %p1617_p9 = por %p1616_p7, %p1615_p6 }
 0x1b4   : > { %p1618_p10 = pnand %p1617_p9, %p1611_p5 }
 0x1b6   : > { %1621 = shalt.err (!%p1618_p10)
}
 0x1b7   : > { %s1622_s13 = scalar_lea.hbm %s1903_s20, 128  ;;  %s1626_s11 = scalar_lea.hbm %s2028_s5, 256 }
 0x1b8   : > { %p1623_p11 = scmp.ne.s32.totalorder %s1903_s20, %s1622_s13  ;;  %p1627_p0 = scmp.lt.u32.totalorder %s1903_s20, %s2028_s5 }
 0x1b9   : > { %p1628_p1 = scmp.lt.u32.totalorder %s1626_s11, %s1622_s13  ;;  %p1630_p3 = scmp.lt.u32.totalorder %s1622_s13, %s1903_s20 }
 0x1ba   : > { %p1624_p12 = pnand %p1623_p11, %p1804_p4 }
 0x1bb   : > { %p1629_p2 = por %p1628_p1, %p1627_p0 }
 0x1bc   : > { %p1625_p13 = pneg %p1624_p12 }
 0x1bd   : > { %p1631_p5 = por %p1630_p3, %p1629_p2 }
 0x1bf   : > { %p1632_p6 = pnand %p1631_p5, %p1625_p13 }
 0x1c1   : > { %1635 = shalt.err (!%p1632_p6)
}
 0x1c2   : > { %1503 = dma.vmem_to_hbm [thread:$0]  (%p1804_p4), %s1919_s8, 128, %s1903_s20, %s1228_s29  }
 0x1c3   : > { %s2056_s0 = scalar_lea.vmem [#allocation6], %s1893_s15  ;;  %s1636_s12 = scalar_lea.vmem %s1927_s1, 128 }
 0x1c4   : > { %1221 = vst [vmem:[%s2056_s0] sm:$0xff] %v1219_v57  ;;  %p1637_p7 = scmp.ne.s32.totalorder %s1927_s1, %s1636_s12  ;;  %s1726_s3 = smov [#allocation6]  }
 0x1c5   : > { %s1640_s18 = sshll.u32 %s1726_s3, 4  ;;  %s1641_s18 = int_to_ptr.vmem [resolvable:$false] %s1640_s18 }
 0x1c6   : > { %p1638_p9 = pnand %p1637_p7, %p1804_p4  ;;  %s1642_s19 = scalar_lea.vmem %s1641_s18, 256 }
 0x1c7   : > { %p1643_p11 = scmp.lt.s32.totalorder %s1927_s1, %s1641_s18  ;;  %p1644_p12 = scmp.lt.s32.totalorder %s1642_s19, %s1636_s12 }
 0x1c8   : > { %p1639_p10 = pneg %p1638_p9 }
 0x1c9   : > { %p1645_p13 = por %p1644_p12, %p1643_p11 }
 0x1cb   : > { %p1646_p0 = pnand %p1645_p13, %p1639_p10 }
 0x1cd   : > { %1649 = shalt.err (!%p1646_p0)
}
 0x1ce   : > { %s1650_s15 = scalar_lea.hbm %s1925_s28, 128  ;;  %s1654_s14 = scalar_lea.hbm %s2029_s6, 256 }
 0x1cf   : > { %p1651_p1 = scmp.ne.s32.totalorder %s1925_s28, %s1650_s15  ;;  %p1655_p5 = scmp.lt.u32.totalorder %s1925_s28, %s2029_s6 }
 0x1d0   : > { %p1656_p6 = scmp.lt.u32.totalorder %s1654_s14, %s1650_s15  ;;  %p1658_p9 = scmp.lt.u32.totalorder %s1650_s15, %s1925_s28 }
 0x1d1   : > { %p1652_p2 = pnand %p1651_p1, %p1804_p4 }
 0x1d2   : > { %p1657_p7 = por %p1656_p6, %p1655_p5 }
 0x1d3   : > { %p1653_p3 = pneg %p1652_p2 }
 0x1d4   : > { %p1659_p10 = por %p1658_p9, %p1657_p7 }
 0x1d6   : > { %p1660_p11 = pnand %p1659_p10, %p1653_p3 }
 0x1d8   : > { %1663 = shalt.err (!%p1660_p11)
}
 0x1d9   : > { %1504 = dma.vmem_to_hbm [thread:$0]  (%p1804_p4), %s1927_s1, 128, %s1925_s28, %s1228_s29  }
 0x1da PF: > { %p1518_p12 = scmp.ge.s32.totalorder %s1718_s26, 2  ;;  %s1287_s24 = sand.u32 1, %s1698_s21  }
 0x1db   : > { %s1288_s2 = scalar_lea.sflag [#allocation3], %s1287_s24 }
 0x1dc   : > { %p1509_p13 = pnand %p1518_p12, %p1813_p8 }
 0x1de   : > { %1689 = dma.done.wait (!%p1509_p13), %s1288_s2, 128  }
 0x1df   : > { %1691 = vsyncadd (!%p1509_p13), %s1288_s2, 4294967168  ;;  %s2057_s11 = sadd.s32 4294967294, %s1718_s26  }
 0x1e0   : > { %s1296_s17 = sand.u32 1, %s2057_s11  }
 0x1e1   : > { %s1297_s7 = scalar_lea.sflag [#allocation5], %s1296_s17 }
 0x1e2   : > { %1693 = dma.done.wait (!%p1509_p13), %s1297_s7, 256  }
 0x1e3   : > { %1695 = vsyncadd (!%p1509_p13), %s1297_s7, 4294967040  ;;  %s23_s26 = sadd.s32 1, %s1718_s26   ;;  %s2058_s1 = sld [smem:[#allocation9_spill]] }
 0x1e4   : > { %p20_p4 = scmp.ge.s32.totalorder %s23_s26, 4   ;;  %s2059_s21 = smov %s1702_s22 }
 0x1e5   : > { %s2060_s22 = smov %s1706_s23  ;;  %s2061_s23 = smov %s1819_s10 }
 0x1e6   : > { %s2062_s24 = smov %s1714_s25  ;;  %22 = sbr.rel (!%p20_p4) target bundleno = 11 (0xb), region = 116 }
 0x1e9   : > { %s2063_s25 = smov %s2058_s1 }
 0x1ed   :  { %1311 = vsyncpa [#allocation3], 1 }
 0x1ee   :  { %1313 = vsyncpa [#allocation3 + $0x1], 1 }
 0x1ef   :  { %1314 = vsyncpa [#allocation5], 1 }
 0x1f0   :  { %1316 = vsyncpa [#allocation5 + $0x1], 1 }

</bundles_post_ra>
